<compile_context>
chip_gen: v5e
topology: v5e:2x2
jax: 0.10.0
libtpu: 0.0.40
codegen_flags: <defaults>
</compile_context>

<pallas_src>
import math

import jax
import jax.numpy as jnp
from jax.experimental import pallas as pl
from jax.experimental.pallas import tpu as pltpu


def _round_up(a, b):
    return ((a + b - 1) // b) * b


def _choose_pack(f, k):
    """Smallest row-packing factor making both packed lane widths (pack*F for
    the matmul input / intermediate and pack*K for the output) multiples of the
    128-lane vreg width (capped at 128)."""
    def need(d):
        return 128 // math.gcd(d, 128)
    nf, nk = need(f), need(k)
    lcm = nf * nk // math.gcd(nf, nk)
    return max(1, min(lcm, 128))


def _num_tensorcores():
    # v7x has 2 TensorCores per chip sharing the 1-D "parallel" grid;
    # v5e/v6e have 1.  Detection failure falls back to 1 (correctness is
    # unaffected; only tail balance on v7x).
    try:
        kind = (jax.devices()[0].device_kind or "").lower()
        if "v7" in kind or "tpu7" in kind:
            return 2
    except Exception:
        pass
    return 1


def _log_prob_kernel(x_ref, b_ref, shift_ref, sel_ref, bias_ref, o_ref):
    # x_ref:     (block_p, pack*F)    packed input rows, lane-dense
    # b_ref:     (pack*F, pack*K*F)   block-diagonal precisions (grid-invariant)
    # shift_ref: (1, pack*K*F)        tiled  L_k @ mu_k                (f32)
    # sel_ref:   (pack*K*F, pack*K)   block-diagonal selector * (-0.5) (f32)
    # bias_ref:  (1, pack*K)          tiled  log_det - 0.5*F*log(2*pi) (f32)
    # o_ref:     (block_p, pack*K)    packed log-probs, lane-dense
    y = jnp.dot(x_ref[...], b_ref[...], preferred_element_type=jnp.float32)
    diff = y - shift_ref[...]               # subtract torch.mv(precisions[k], mu[k])
    sq = diff * diff
    neg_half_exp = jnp.dot(sq, sel_ref[...], preferred_element_type=jnp.float32)
    o_ref[...] = (neg_half_exp + bias_ref[...]).astype(o_ref.dtype)


def full_gaussian_log_prob(x, mu, sigma, *, block_n=2048):
    """Pallas implementation of FullGaussianEmissionModel.forward (= log_prob)."""
    n, f = x.shape
    k = mu.shape[0]

    # ---------------- parameter-side glue (plain JAX, float32) ---------------
    L = jnp.linalg.cholesky(sigma.astype(jnp.float32))   # torch.cholesky(sigma, upper=False)
    precisions = L                                        # see NOTE above (I @ X = L  =>  X = L)
    shift = jnp.einsum('kij,kj->ki', precisions, mu.astype(jnp.float32))          # (K, F)
    log_det = jnp.sum(jnp.log(jnp.diagonal(precisions, axis1=-2, axis2=-1)), -1)  # (K,)

    pack = _choose_pack(f, k)                             # 32 for F=8, K=4
    kf = k * f

    # P2d[f, k*F+g] = precisions[k, f, g]
    p2d = jnp.transpose(precisions, (1, 0, 2)).reshape(f, kf)                     # (F, K*F)
    eye_p = jnp.eye(pack, dtype=jnp.float32)
    # Block-diagonal: B[p*F+f, q*K*F+c] = (p==q) * P2d[f, c]
    b_mat = jnp.einsum('pq,fc->pfqc', eye_p, p2d).reshape(pack * f, pack * kf)    # (pack*F, pack*K*F)
    shift_packed = jnp.tile(shift.reshape(1, kf), (1, pack))                      # (1, pack*K*F)

    # Segment selector (carries the -0.5): S[q*K*F + kF+g, q*K + k] = -0.5
    row_state = jnp.arange(kf, dtype=jnp.int32)[:, None] // f
    col_state = jnp.arange(k, dtype=jnp.int32)[None, :]
    sel_small = jnp.where(row_state == col_state, jnp.float32(-0.5), jnp.float32(0.0))
    sel = jnp.einsum('pq,ac->paqc', eye_p, sel_small).reshape(pack * kf, pack * k)  # (pack*K*F, pack*K)

    bias = (log_det - 0.5 * f * math.log(2.0 * math.pi)).reshape(1, k)
    bias_packed = jnp.tile(bias, (1, pack))                                        # (1, pack*K)

    # MXU input dtype: keep bf16 as bf16 (f32 accumulation), everything else f32.
    if x.dtype == jnp.bfloat16:
        compute_dtype = jnp.bfloat16
        out_dtype = jnp.bfloat16
        x_c = x
    else:
        compute_dtype = jnp.float32
        out_dtype = jnp.float32
        x_c = x.astype(jnp.float32)
    b_mat = b_mat.astype(compute_dtype)

    # ---------------- tile-size / padding selection ---------------------------
    num_tc = _num_tensorcores()
    r_min = max(1, -(-n // pack))                      # packed rows needed
    r8 = _round_up(r_min, 8)                           # sublane-aligned packed rows
    block_p = min(_round_up(max(block_n // pack, 8), 8), r8)   # packed rows per tile (mult of 8)
    steps = -(-r8 // block_p)
    if num_tc > 1 and steps > 1 and (steps % 2):       # v7x: keep both TCs busy
        steps += 1
    r_total = steps * block_p
    n_padded = r_total * pack

    if n_padded != n:
        x_c = jnp.pad(x_c, ((0, n_padded - n), (0, 0)))
    x_packed = x_c.reshape(r_total, pack * f)          # free row-major reshape

    itemsize = jnp.dtype(compute_dtype).itemsize
    cost = pl.CostEstimate(
        flops=2 * r_total * (pack * f) * (pack * kf) + 2 * r_total * (pack * kf) * (pack * k),
        bytes_accessed=(n_padded * f * itemsize
                        + b_mat.size * itemsize
                        + 4 * (shift_packed.size + sel.size + bias_packed.size)
                        + n_padded * k * jnp.dtype(out_dtype).itemsize),
        transcendentals=0,
    )

    out_packed = pl.pallas_call(
        _log_prob_kernel,
        out_shape=jax.ShapeDtypeStruct((r_total, pack * k), out_dtype),
        grid_spec=pltpu.PrefetchScalarGridSpec(
            num_scalar_prefetch=0,
            grid=(steps,),
            in_specs=[
                pl.BlockSpec((block_p, pack * f), lambda i: (i, 0)),     # packed x rows (pipelined)
                pl.BlockSpec((pack * f, pack * kf), lambda i: (0, 0)),   # block-diag precisions
                pl.BlockSpec((1, pack * kf), lambda i: (0, 0)),          # packed shift
                pl.BlockSpec((pack * kf, pack * k), lambda i: (0, 0)),   # block-diag selector
                pl.BlockSpec((1, pack * k), lambda i: (0, 0)),           # packed bias
            ],
            out_specs=pl.BlockSpec((block_p, pack * k), lambda i: (i, 0)),
        ),
        compiler_params=pltpu.CompilerParams(
            dimension_semantics=("parallel",),
            vmem_limit_bytes=32 * 1024 * 1024,
        ),
        cost_estimate=cost,
    )(x_packed, b_mat, shift_packed, sel, bias_packed)

    out = out_packed.reshape(n_padded, k)               # free row-major reshape back
    return out[:n] if n_padded != n else out


def _ref_log_prob(x, mu, sigma):
    """Pure-JAX transcription of the PyTorch log_prob (for validation)."""
    f = x.shape[1]
    L = jnp.linalg.cholesky(sigma)
    precisions = L                                       # code-as-written semantics
    cols = []
    for s in range(mu.shape[0]):
        y = x @ precisions[s] - precisions[s] @ mu[s]
        cols.append(jnp.sum(y * y, axis=1))
    exp_term = jnp.stack(cols, axis=1)
    log_det = jnp.sum(jnp.log(jnp.diagonal(precisions, axis1=-2, axis2=-1)), axis=-1)
    return -0.5 * (f * math.log(2.0 * math.pi) + exp_term) + log_det


if __name__ == "__main__":
    n_states, n_feats, n_obs = 4, 8, 16
    key = jax.random.PRNGKey(0)
    k_mu, k_sig, k_x, k_x2 = jax.random.split(key, 4)

    # Deterministic parameter init mirroring reset_parameters():
    #   mu ~ N(0, 1);   sigma = R @ R^T + 0.001  with  R ~ U[0, 1)
    mu = jax.random.normal(k_mu, (n_states, n_feats), dtype=jnp.float32)
    r = jax.random.uniform(k_sig, (n_states, n_feats, n_feats), dtype=jnp.float32)
    sigma = jnp.matmul(r, jnp.swapaxes(r, -1, -2)) + 0.001

    # Small shape matching the module interface.
    x = jax.random.normal(k_x, (n_obs, n_feats), dtype=jnp.float32)
    out = jax.block_until_ready(full_gaussian_log_prob(x, mu, sigma))
    ref = _ref_log_prob(x, mu, sigma)
    assert out.shape == (n_obs, n_states)
    assert jnp.allclose(out, ref, atol=1e-3, rtol=1e-4), (out, ref)

    # Larger, non-multiple N with a small tile to exercise the multi-step grid
    # and the padding/slice path.
    n_big = 1000
    x_big = jax.random.normal(k_x2, (n_big, n_feats), dtype=jnp.float32)
    out_big = jax.block_until_ready(full_gaussian_log_prob(x_big, mu, sigma, block_n=512))
    ref_big = _ref_log_prob(x_big, mu, sigma)
    assert out_big.shape == (n_big, n_states)
    assert jnp.allclose(out_big, ref_big, atol=1e-3, rtol=1e-4)

    print("KERNEL_OK")
</pallas_src>

<mosaic_0001>
module attributes {stable_mosaic.version = 11 : i64} {
  func.func @_log_prob_kernel(%arg0: i32, %arg1: memref<8x256xf32, #tpu.memory_space<vmem>>, %arg2: memref<256x1024xf32, #tpu.memory_space<vmem>>, %arg3: memref<1x1024xf32, #tpu.memory_space<vmem>>, %arg4: memref<1024x128xf32, #tpu.memory_space<vmem>>, %arg5: memref<1x128xf32, #tpu.memory_space<vmem>>, %arg6: memref<8x128xf32, #tpu.memory_space<vmem>>) attributes {dimension_semantics = [#tpu.dimension_semantics<parallel>], iteration_bounds = array<i64: 1>, scalar_prefetch = 0 : i64, scratch_operands = 0 : i64, tpu.core_type = #tpu.core_type<tc>, window_params = [{transform_indices = @transform_0, window_bounds = array<i64: 8, 256>}, {pipeline_mode = #tpu.pipeline_mode<synchronous>, transform_indices = @transform_1, window_bounds = array<i64: 256, 1024>}, {pipeline_mode = #tpu.pipeline_mode<synchronous>, transform_indices = @transform_2, window_bounds = array<i64: 1, 1024>}, {pipeline_mode = #tpu.pipeline_mode<synchronous>, transform_indices = @transform_3, window_bounds = array<i64: 1024, 128>}, {pipeline_mode = #tpu.pipeline_mode<synchronous>, transform_indices = @transform_4, window_bounds = array<i64: 1, 128>}, {transform_indices = @transform_5, window_bounds = array<i64: 8, 128>}]} {
    %c0 = arith.constant 0 : index
    %c0_0 = arith.constant 0 : index
    %0 = vector.load %arg1[%c0, %c0_0] : memref<8x256xf32, #tpu.memory_space<vmem>>, vector<8x256xf32>
    %c0_1 = arith.constant 0 : index
    %c0_2 = arith.constant 0 : index
    %1 = vector.load %arg2[%c0_1, %c0_2] : memref<256x1024xf32, #tpu.memory_space<vmem>>, vector<256x1024xf32>
    %cst = arith.constant dense<0.000000e+00> : vector<8x1024xf32>
    %2 = tpu.matmul %0, %1, %cst {dimension_numbers = #tpu.dot_dimension_numbers<[1], [0], [0], [1], [0, 0, 1, 1], [], []>} : vector<8x256xf32>, vector<256x1024xf32>, vector<8x1024xf32> -> vector<8x1024xf32>
    %c0_3 = arith.constant 0 : index
    %c0_4 = arith.constant 0 : index
    %3 = vector.load %arg3[%c0_3, %c0_4] : memref<1x1024xf32, #tpu.memory_space<vmem>>, vector<1x1024xf32>
    %4 = vector.broadcast %3 : vector<1x1024xf32> to vector<8x1024xf32>
    %5 = arith.subf %2, %4 : vector<8x1024xf32>
    %6 = arith.mulf %5, %5 : vector<8x1024xf32>
    %c0_5 = arith.constant 0 : index
    %c0_6 = arith.constant 0 : index
    %7 = vector.load %arg4[%c0_5, %c0_6] : memref<1024x128xf32, #tpu.memory_space<vmem>>, vector<1024x128xf32>
    %cst_7 = arith.constant dense<0.000000e+00> : vector<8x128xf32>
    %8 = tpu.matmul %6, %7, %cst_7 {dimension_numbers = #tpu.dot_dimension_numbers<[1], [0], [0], [1], [0, 0, 1, 1], [], []>} : vector<8x1024xf32>, vector<1024x128xf32>, vector<8x128xf32> -> vector<8x128xf32>
    %c0_8 = arith.constant 0 : index
    %c0_9 = arith.constant 0 : index
    %9 = vector.load %arg5[%c0_8, %c0_9] : memref<1x128xf32, #tpu.memory_space<vmem>>, vector<1x128xf32>
    %10 = vector.broadcast %9 : vector<1x128xf32> to vector<8x128xf32>
    %11 = arith.addf %8, %10 : vector<8x128xf32>
    %c0_10 = arith.constant 0 : index
    %c0_11 = arith.constant 0 : index
    %12 = vector.load %arg6[%c0_10, %c0_11] : memref<8x128xf32, #tpu.memory_space<vmem>>, vector<8x128xf32>
    tpu.vector_store %arg6[%c0_10, %c0_11], %11 {strides = array<i32>} : memref<8x128xf32, #tpu.memory_space<vmem>>, vector<8x128xf32>,
    return
  }
  func.func @transform_0(%arg0: i32) -> (i32, i32) {
    %c0_i32 = arith.constant 0 : i32
    %c0_i32_0 = arith.constant 0 : i32
    return %arg0, %c0_i32 : i32, i32
  }
  func.func @transform_1(%arg0: i32) -> (i32, i32) {
    %c0_i32 = arith.constant 0 : i32
    %c0_i32_0 = arith.constant 0 : i32
    %c0_i32_1 = arith.constant 0 : i32
    return %c0_i32, %c0_i32_0 : i32, i32
  }
  func.func @transform_2(%arg0: i32) -> (i32, i32) {
    %c0_i32 = arith.constant 0 : i32
    %c0_i32_0 = arith.constant 0 : i32
    %c0_i32_1 = arith.constant 0 : i32
    return %c0_i32, %c0_i32_0 : i32, i32
  }
  func.func @transform_3(%arg0: i32) -> (i32, i32) {
    %c0_i32 = arith.constant 0 : i32
    %c0_i32_0 = arith.constant 0 : i32
    %c0_i32_1 = arith.constant 0 : i32
    return %c0_i32, %c0_i32_0 : i32, i32
  }
  func.func @transform_4(%arg0: i32) -> (i32, i32) {
    %c0_i32 = arith.constant 0 : i32
    %c0_i32_0 = arith.constant 0 : i32
    %c0_i32_1 = arith.constant 0 : i32
    return %c0_i32, %c0_i32_0 : i32, i32
  }
  func.func @transform_5(%arg0: i32) -> (i32, i32) {
    %c0_i32 = arith.constant 0 : i32
    %c0_i32_0 = arith.constant 0 : i32
    return %arg0, %c0_i32 : i32, i32
  }
}

</mosaic_0001>

<bundles_post_ra>
// kernel: tpu_custom_call.1
= control target key start
LH: loop header
LB: loop body
LE: loop exit
PB: predicated region body
PF: predicated region fallthrough
CT: control target
= control target key end

     0   :  { %10 = vsyncpa [#allocation3], 0  ;;  %s1229_s0 = inlined_call_operand.hbm [shape: f32[8,256], index: 0, kind: input, shape index: {}]   ;;  %s1230_s1 = inlined_call_operand.hbm [shape: f32[256,1024], index: 1, kind: input, shape index: {}]   ;;  %s1231_s2 = inlined_call_operand.hbm [shape: f32[1,1024], index: 2, kind: input, shape index: {}]   ;;  %s1232_s3 = inlined_call_operand.hbm [shape: f32[1024,128], index: 3, kind: input, shape index: {}]   ;;  %s1233_s4 = inlined_call_operand.vmem [shape: f32[1,128], index: 4, kind: input, shape index: {}]   ;;  %s1234_s5 = inlined_call_operand.hbm [shape: f32[8,128], index: 5, kind: output, shape index: {}]  }
   0x1   :  { %11 = vsyncpa [#allocation6], 0 }
   0x2   :  { %12 = vsyncpa [#allocation9], 0  ;;  %s29_s20 = sshll.u32 %s1230_s1, 4  ;;  %s30_s20 = int_to_ptr.hbm [resolvable:$true] %s29_s20 }
   0x3   :  { %13 = vsyncpa [#allocation4], 0  ;;  %s1142_s21 = smov [#allocation5]   ;;  %s19_s25 = sshll.u32 %s1229_s0, 4  ;;  %s20_s25 = int_to_ptr.hbm [resolvable:$true] %s19_s25 }
   0x4   :  { %s31_s22 = sshll.u32 %s1142_s21, 4  ;;  %s1143_s26 = smov 1024   ;;  %s32_s22 = int_to_ptr.vmem [resolvable:$true] %s31_s22 }
   0x5   :  { %s1144_s27 = smov 64   ;;  %s1145_s28 = smov [#allocation2]  }
   0x6   :  { %37 = dma.hbm_to_vmem [thread:$0]  %s30_s20, 32768, %s32_s22, [#allocation6], %s1143_s26, %s1143_s26, %s1144_s27  }
   0x7   :  { %s21_s29 = sshll.u32 %s1145_s28, 4  ;;  %s43_s7 = sshll.u32 %s1231_s2, 4  ;;  %s22_s29 = int_to_ptr.vmem [resolvable:$true] %s21_s29  ;;  %s44_s7 = int_to_ptr.hbm [resolvable:$true] %s43_s7 }
   0x8   :  { %24 = dma.hbm_to_vmem [thread:$0]  %s20_s25, 256, %s22_s29, [#allocation3]  }
   0x9   :  { %s53_s9 = sshll.u32 %s1232_s3, 4  ;;  %s1146_s10 = smov [#allocation7]   ;;  %s54_s9 = int_to_ptr.hbm [resolvable:$true] %s53_s9 }
   0xa   :  { %s45_s11 = sshll.u32 %s1146_s10, 4  ;;  %s1147_s0 = smov [#allocation8]   ;;  %s46_s11 = int_to_ptr.vmem [resolvable:$true] %s45_s11 }
   0xb   :  { %48 = dma.hbm_to_vmem [thread:$0]  %s44_s7, 128, %s46_s11, [#allocation6]  }
   0xc   :  { %s55_s12 = sshll.u32 %s1147_s0, 4  ;;  %s1148_s13 = smov 128   ;;  %s56_s12 = int_to_ptr.vmem [resolvable:$true] %s55_s12 }
   0xd   :  { %s1149_s14 = smov 8  }
   0xe   :  { %61 = dma.hbm_to_vmem [thread:$0]  %s54_s9, 16384, %s56_s12, [#allocation9], %s1148_s13, %s1148_s13, %s1149_s14  }
   0xf   :  { %1134 = dma.done.wait [#allocation3], 256  }
  0x10   :  { %1135 = vsyncadd [#allocation3], 4294967040 }
  0x11   :  { %1136 = dma.done.wait [#allocation6], 32896  }
  0x12   :  { %1137 = vsyncadd [#allocation6], 4294934400 }
  0x13   :  { %1138 = dma.done.wait [#allocation9], 16384  }
  0x14   :  { %1139 = vsyncadd [#allocation9], 4294950912  ;;  %v202_v0 = vld [vmem:[#allocation5 + $0x3c0] sm:$0xff]  ;;  %v203_v2 = vld [vmem:[#allocation5 + $0x3c8] sm:$0xff]  ;;  %s1150_s15 = smov [#allocation10]   ;;  %s992_s19 = sshll.u32 %s1234_s5, 4  ;;  %s993_s19 = int_to_ptr.hbm [resolvable:$true] %s992_s19 }
  0x15   :  { %v330_v1 = vld [vmem:[#allocation5 + $0x7c0] sm:$0xff]  ;;  %338 = vmatpush.msra.mxu0 %v202_v0  ;;  %v331_v3 = vld [vmem:[#allocation5 + $0x7c8] sm:$0xff]  ;;  %378 = vmatpush.msra.mxu2 %v203_v2  ;;  %v204_v0 = vld [vmem:[#allocation5 + $0x3d0] sm:$0xff]  ;;  %s990_s16 = sshll.u32 %s1150_s15, 4  ;;  %s991_s16 = int_to_ptr.vmem [resolvable:$true] %s990_s16 }
  0x16   :  { %358 = vmatpush.msra.mxu1 %v330_v1  ;;  %v194_v4 = vld [vmem:[#allocation5 + $0x380] sm:$0xff]  ;;  %398 = vmatpush.msra.mxu3 %v331_v3  ;;  %v195_v6 = vld [vmem:[#allocation5 + $0x388] sm:$0xff]  ;;  %v332_v1 = vld [vmem:[#allocation5 + $0x7d0] sm:$0xff] }
  0x17   :  { %v322_v5 = vld [vmem:[#allocation5 + $0x780] sm:$0xff]  ;;  %v323_v7 = vld [vmem:[#allocation5 + $0x788] sm:$0xff]  ;;  %339 = vmatpush.msra.mxu0 %v194_v4  ;;  %379 = vmatpush.msra.mxu2 %v195_v6  ;;  %v205_v2 = vld [vmem:[#allocation5 + $0x3d8] sm:$0xff] }
  0x18   :  { %v186_v8 = vld [vmem:[#allocation5 + $0x340] sm:$0xff]  ;;  %359 = vmatpush.msra.mxu1 %v322_v5  ;;  %v187_v10 = vld [vmem:[#allocation5 + $0x348] sm:$0xff]  ;;  %399 = vmatpush.msra.mxu3 %v323_v7  ;;  %v333_v3 = vld [vmem:[#allocation5 + $0x7d8] sm:$0xff] }
  0x19   :  { %v314_v9 = vld [vmem:[#allocation5 + $0x740] sm:$0xff]  ;;  %v315_v11 = vld [vmem:[#allocation5 + $0x748] sm:$0xff]  ;;  %340 = vmatpush.msra.mxu0 %v186_v8  ;;  %380 = vmatpush.msra.mxu2 %v187_v10  ;;  %v196_v4 = vld [vmem:[#allocation5 + $0x390] sm:$0xff] }
  0x1a   :  { %v178_v12 = vld [vmem:[#allocation5 + $0x300] sm:$0xff]  ;;  %360 = vmatpush.msra.mxu1 %v314_v9  ;;  %v179_v14 = vld [vmem:[#allocation5 + $0x308] sm:$0xff]  ;;  %400 = vmatpush.msra.mxu3 %v315_v11  ;;  %v324_v5 = vld [vmem:[#allocation5 + $0x790] sm:$0xff] }
  0x1b   :  { %v306_v13 = vld [vmem:[#allocation5 + $0x700] sm:$0xff]  ;;  %v307_v15 = vld [vmem:[#allocation5 + $0x708] sm:$0xff]  ;;  %341 = vmatpush.msra.mxu0 %v178_v12  ;;  %381 = vmatpush.msra.mxu2 %v179_v14  ;;  %v197_v6 = vld [vmem:[#allocation5 + $0x398] sm:$0xff] }
  0x1c   :  { %v170_v16 = vld [vmem:[#allocation5 + $0x2c0] sm:$0xff]  ;;  %361 = vmatpush.msra.mxu1 %v306_v13  ;;  %v171_v18 = vld [vmem:[#allocation5 + $0x2c8] sm:$0xff]  ;;  %401 = vmatpush.msra.mxu3 %v307_v15  ;;  %v325_v7 = vld [vmem:[#allocation5 + $0x798] sm:$0xff] }
  0x1d   :  { %v298_v17 = vld [vmem:[#allocation5 + $0x6c0] sm:$0xff]  ;;  %v299_v19 = vld [vmem:[#allocation5 + $0x6c8] sm:$0xff]  ;;  %342 = vmatpush.msra.mxu0 %v170_v16  ;;  %382 = vmatpush.msra.mxu2 %v171_v18  ;;  %v188_v8 = vld [vmem:[#allocation5 + $0x350] sm:$0xff] }
  0x1e   :  { %v162_v20 = vld [vmem:[#allocation5 + $0x280] sm:$0xff]  ;;  %362 = vmatpush.msra.mxu1 %v298_v17  ;;  %v163_v22 = vld [vmem:[#allocation5 + $0x288] sm:$0xff]  ;;  %402 = vmatpush.msra.mxu3 %v299_v19  ;;  %v316_v9 = vld [vmem:[#allocation5 + $0x750] sm:$0xff] }
  0x1f   :  { %v290_v21 = vld [vmem:[#allocation5 + $0x680] sm:$0xff]  ;;  %v291_v23 = vld [vmem:[#allocation5 + $0x688] sm:$0xff]  ;;  %343 = vmatpush.msra.mxu0 %v162_v20  ;;  %383 = vmatpush.msra.mxu2 %v163_v22  ;;  %v189_v10 = vld [vmem:[#allocation5 + $0x358] sm:$0xff] }
  0x20   :  { %v154_v24 = vld [vmem:[#allocation5 + $0x240] sm:$0xff]  ;;  %363 = vmatpush.msra.mxu1 %v290_v21  ;;  %v155_v26 = vld [vmem:[#allocation5 + $0x248] sm:$0xff]  ;;  %403 = vmatpush.msra.mxu3 %v291_v23  ;;  %v317_v11 = vld [vmem:[#allocation5 + $0x758] sm:$0xff] }
  0x21   :  { %v282_v25 = vld [vmem:[#allocation5 + $0x640] sm:$0xff]  ;;  %v283_v27 = vld [vmem:[#allocation5 + $0x648] sm:$0xff]  ;;  %344 = vmatpush.msra.mxu0 %v154_v24  ;;  %384 = vmatpush.msra.mxu2 %v155_v26  ;;  %v180_v12 = vld [vmem:[#allocation5 + $0x310] sm:$0xff] }
  0x22   :  { %v146_v28 = vld [vmem:[#allocation5 + $0x200] sm:$0xff]  ;;  %364 = vmatpush.msra.mxu1 %v282_v25  ;;  %v147_v30 = vld [vmem:[#allocation5 + $0x208] sm:$0xff]  ;;  %404 = vmatpush.msra.mxu3 %v283_v27  ;;  %v308_v13 = vld [vmem:[#allocation5 + $0x710] sm:$0xff] }
  0x23   :  { %v274_v29 = vld [vmem:[#allocation5 + $0x600] sm:$0xff]  ;;  %v275_v31 = vld [vmem:[#allocation5 + $0x608] sm:$0xff]  ;;  %345 = vmatpush.msra.mxu0 %v146_v28  ;;  %385 = vmatpush.msra.mxu2 %v147_v30  ;;  %v181_v14 = vld [vmem:[#allocation5 + $0x318] sm:$0xff] }
  0x24   :  { %v138_v32 = vld [vmem:[#allocation5 + $0x1c0] sm:$0xff]  ;;  %365 = vmatpush.msra.mxu1 %v274_v29  ;;  %v139_v34 = vld [vmem:[#allocation5 + $0x1c8] sm:$0xff]  ;;  %405 = vmatpush.msra.mxu3 %v275_v31  ;;  %v309_v15 = vld [vmem:[#allocation5 + $0x718] sm:$0xff] }
  0x25   :  { %v266_v33 = vld [vmem:[#allocation5 + $0x5c0] sm:$0xff]  ;;  %v267_v35 = vld [vmem:[#allocation5 + $0x5c8] sm:$0xff]  ;;  %346 = vmatpush.msra.mxu0 %v138_v32  ;;  %386 = vmatpush.msra.mxu2 %v139_v34  ;;  %v172_v16 = vld [vmem:[#allocation5 + $0x2d0] sm:$0xff] }
  0x26   :  { %v130_v36 = vld [vmem:[#allocation5 + $0x180] sm:$0xff]  ;;  %366 = vmatpush.msra.mxu1 %v266_v33  ;;  %v131_v38 = vld [vmem:[#allocation5 + $0x188] sm:$0xff]  ;;  %406 = vmatpush.msra.mxu3 %v267_v35  ;;  %v300_v17 = vld [vmem:[#allocation5 + $0x6d0] sm:$0xff] }
  0x27   :  { %v258_v37 = vld [vmem:[#allocation5 + $0x580] sm:$0xff]  ;;  %v259_v39 = vld [vmem:[#allocation5 + $0x588] sm:$0xff]  ;;  %347 = vmatpush.msra.mxu0 %v130_v36  ;;  %387 = vmatpush.msra.mxu2 %v131_v38  ;;  %v173_v18 = vld [vmem:[#allocation5 + $0x2d8] sm:$0xff] }
  0x28   :  { %v122_v40 = vld [vmem:[#allocation5 + $0x140] sm:$0xff]  ;;  %367 = vmatpush.msra.mxu1 %v258_v37  ;;  %v123_v42 = vld [vmem:[#allocation5 + $0x148] sm:$0xff]  ;;  %407 = vmatpush.msra.mxu3 %v259_v39  ;;  %v301_v19 = vld [vmem:[#allocation5 + $0x6d8] sm:$0xff] }
  0x29   :  { %v250_v41 = vld [vmem:[#allocation5 + $0x540] sm:$0xff]  ;;  %v251_v43 = vld [vmem:[#allocation5 + $0x548] sm:$0xff]  ;;  %348 = vmatpush.msra.mxu0 %v122_v40  ;;  %388 = vmatpush.msra.mxu2 %v123_v42  ;;  %v164_v20 = vld [vmem:[#allocation5 + $0x290] sm:$0xff] }
  0x2a   :  { %v114_v44 = vld [vmem:[#allocation5 + $0x100] sm:$0xff]  ;;  %368 = vmatpush.msra.mxu1 %v250_v41  ;;  %v115_v46 = vld [vmem:[#allocation5 + $0x108] sm:$0xff]  ;;  %408 = vmatpush.msra.mxu3 %v251_v43  ;;  %v292_v21 = vld [vmem:[#allocation5 + $0x690] sm:$0xff] }
  0x2b   :  { %v242_v45 = vld [vmem:[#allocation5 + $0x500] sm:$0xff]  ;;  %v243_v47 = vld [vmem:[#allocation5 + $0x508] sm:$0xff]  ;;  %349 = vmatpush.msra.mxu0 %v114_v44  ;;  %389 = vmatpush.msra.mxu2 %v115_v46  ;;  %v165_v22 = vld [vmem:[#allocation5 + $0x298] sm:$0xff] }
  0x2c   :  { %v106_v48 = vld [vmem:[#allocation5 + $0xc0] sm:$0xff]  ;;  %369 = vmatpush.msra.mxu1 %v242_v45  ;;  %v107_v50 = vld [vmem:[#allocation5 + $0xc8] sm:$0xff]  ;;  %409 = vmatpush.msra.mxu3 %v243_v47  ;;  %v293_v23 = vld [vmem:[#allocation5 + $0x698] sm:$0xff] }
  0x2d   :  { %v234_v49 = vld [vmem:[#allocation5 + $0x4c0] sm:$0xff]  ;;  %v235_v51 = vld [vmem:[#allocation5 + $0x4c8] sm:$0xff]  ;;  %350 = vmatpush.msra.mxu0 %v106_v48  ;;  %390 = vmatpush.msra.mxu2 %v107_v50  ;;  %v156_v24 = vld [vmem:[#allocation5 + $0x250] sm:$0xff] }
  0x2e   :  { %v98_v52 = vld [vmem:[#allocation5 + $0x80] sm:$0xff]  ;;  %370 = vmatpush.msra.mxu1 %v234_v49  ;;  %v99_v54 = vld [vmem:[#allocation5 + $0x88] sm:$0xff]  ;;  %410 = vmatpush.msra.mxu3 %v235_v51  ;;  %v284_v25 = vld [vmem:[#allocation5 + $0x650] sm:$0xff] }
  0x2f   :  { %v226_v53 = vld [vmem:[#allocation5 + $0x480] sm:$0xff]  ;;  %v227_v55 = vld [vmem:[#allocation5 + $0x488] sm:$0xff]  ;;  %351 = vmatpush.msra.mxu0 %v98_v52  ;;  %391 = vmatpush.msra.mxu2 %v99_v54  ;;  %v157_v26 = vld [vmem:[#allocation5 + $0x258] sm:$0xff] }
  0x30   :  { %v90_v56 = vld [vmem:[#allocation5 + $0x40] sm:$0xff]  ;;  %371 = vmatpush.msra.mxu1 %v226_v53  ;;  %v91_v58 = vld [vmem:[#allocation5 + $0x48] sm:$0xff]  ;;  %411 = vmatpush.msra.mxu3 %v227_v55  ;;  %v285_v27 = vld [vmem:[#allocation5 + $0x658] sm:$0xff] }
  0x31   :  { %v218_v57 = vld [vmem:[#allocation5 + $0x440] sm:$0xff]  ;;  %v219_v59 = vld [vmem:[#allocation5 + $0x448] sm:$0xff]  ;;  %352 = vmatpush.msra.mxu0 %v90_v56  ;;  %392 = vmatpush.msra.mxu2 %v91_v58  ;;  %v148_v28 = vld [vmem:[#allocation5 + $0x210] sm:$0xff] }
  0x32   :  { %v82_v60 = vld [vmem:[#allocation5] sm:$0xff]  ;;  %372 = vmatpush.msra.mxu1 %v218_v57  ;;  %v83_v62 = vld [vmem:[#allocation5 + $0x8] sm:$0xff]  ;;  %412 = vmatpush.msra.mxu3 %v219_v59  ;;  %v276_v29 = vld [vmem:[#allocation5 + $0x610] sm:$0xff] }
  0x33   :  { %v210_v61 = vld [vmem:[#allocation5 + $0x400] sm:$0xff]  ;;  %v211_v63 = vld [vmem:[#allocation5 + $0x408] sm:$0xff]  ;;  %353 = vmatpush.msra.mxu0 %v82_v60  ;;  %393 = vmatpush.msra.mxu2 %v83_v62  ;;  %v149_v30 = vld [vmem:[#allocation5 + $0x218] sm:$0xff] }
  0x34   :  { %373 = vmatpush.msra.mxu1 %v210_v61  ;;  %413 = vmatpush.msra.mxu3 %v211_v63  ;;  %v277_v31 = vld [vmem:[#allocation5 + $0x618] sm:$0xff]  ;;  %v140_v32 = vld [vmem:[#allocation5 + $0x1d0] sm:$0xff] }
  0x35   :  { %418 = vmatpush.msrb.mxu0 %v204_v0  ;;  %458 = vmatpush.msrb.mxu2 %v205_v2  ;;  %v268_v33 = vld [vmem:[#allocation5 + $0x5d0] sm:$0xff]  ;;  %v141_v34 = vld [vmem:[#allocation5 + $0x1d8] sm:$0xff]  ;;  %v206_v2 = vld [vmem:[#allocation5 + $0x3e0] sm:$0xff] }
  0x36   :  { %438 = vmatpush.msrb.mxu1 %v332_v1  ;;  %478 = vmatpush.msrb.mxu3 %v333_v3  ;;  %v269_v35 = vld [vmem:[#allocation5 + $0x5d8] sm:$0xff]  ;;  %v132_v36 = vld [vmem:[#allocation5 + $0x190] sm:$0xff]  ;;  %v334_v3 = vld [vmem:[#allocation5 + $0x7e0] sm:$0xff] }
  0x37   :  { %419 = vmatpush.msrb.mxu0 %v196_v4  ;;  %459 = vmatpush.msrb.mxu2 %v197_v6  ;;  %v260_v37 = vld [vmem:[#allocation5 + $0x590] sm:$0xff]  ;;  %v133_v38 = vld [vmem:[#allocation5 + $0x198] sm:$0xff]  ;;  %v207_v4 = vld [vmem:[#allocation5 + $0x3e8] sm:$0xff] }
  0x38   :  { %439 = vmatpush.msrb.mxu1 %v324_v5  ;;  %479 = vmatpush.msrb.mxu3 %v325_v7  ;;  %v261_v39 = vld [vmem:[#allocation5 + $0x598] sm:$0xff]  ;;  %v124_v40 = vld [vmem:[#allocation5 + $0x150] sm:$0xff]  ;;  %v335_v5 = vld [vmem:[#allocation5 + $0x7e8] sm:$0xff] }
  0x39   :  { %420 = vmatpush.msrb.mxu0 %v188_v8  ;;  %460 = vmatpush.msrb.mxu2 %v189_v10  ;;  %v252_v41 = vld [vmem:[#allocation5 + $0x550] sm:$0xff]  ;;  %v125_v42 = vld [vmem:[#allocation5 + $0x158] sm:$0xff]  ;;  %v198_v6 = vld [vmem:[#allocation5 + $0x3a0] sm:$0xff] }
  0x3a   :  { %440 = vmatpush.msrb.mxu1 %v316_v9  ;;  %480 = vmatpush.msrb.mxu3 %v317_v11  ;;  %v253_v43 = vld [vmem:[#allocation5 + $0x558] sm:$0xff]  ;;  %v116_v44 = vld [vmem:[#allocation5 + $0x110] sm:$0xff]  ;;  %v326_v7 = vld [vmem:[#allocation5 + $0x7a0] sm:$0xff] }
  0x3b   :  { %421 = vmatpush.msrb.mxu0 %v180_v12  ;;  %461 = vmatpush.msrb.mxu2 %v181_v14  ;;  %v244_v45 = vld [vmem:[#allocation5 + $0x510] sm:$0xff]  ;;  %v117_v46 = vld [vmem:[#allocation5 + $0x118] sm:$0xff]  ;;  %v199_v8 = vld [vmem:[#allocation5 + $0x3a8] sm:$0xff] }
  0x3c   :  { %441 = vmatpush.msrb.mxu1 %v308_v13  ;;  %481 = vmatpush.msrb.mxu3 %v309_v15  ;;  %v245_v47 = vld [vmem:[#allocation5 + $0x518] sm:$0xff]  ;;  %v1193_v48 = vld [vmem:[#allocation2] sm:$0xff]  ;;  %v327_v9 = vld [vmem:[#allocation5 + $0x7a8] sm:$0xff] }
  0x3d   :  { %422 = vmatpush.msrb.mxu0 %v172_v16  ;;  %462 = vmatpush.msrb.mxu2 %v173_v18  ;;  %v1195_v49 = vld [vmem:[#allocation2 + $0x8] sm:$0xff]  ;;  %v108_v50 = vld [vmem:[#allocation5 + $0xd0] sm:$0xff]  ;;  %v190_v10 = vld [vmem:[#allocation5 + $0x360] sm:$0xff] }
  0x3e   :  { %442 = vmatpush.msrb.mxu1 %v300_v17  ;;  %482 = vmatpush.msrb.mxu3 %v301_v19  ;;  %v236_v51 = vld [vmem:[#allocation5 + $0x4d0] sm:$0xff]  ;;  %v109_v52 = vld [vmem:[#allocation5 + $0xd8] sm:$0xff]  ;;  %v318_v11 = vld [vmem:[#allocation5 + $0x760] sm:$0xff] }
  0x3f   :  { %423 = vmatpush.msrb.mxu0 %v164_v20  ;;  %463 = vmatpush.msrb.mxu2 %v165_v22  ;;  %v237_v53 = vld [vmem:[#allocation5 + $0x4d8] sm:$0xff]  ;;  %v100_v54 = vld [vmem:[#allocation5 + $0x90] sm:$0xff]  ;;  %v191_v12 = vld [vmem:[#allocation5 + $0x368] sm:$0xff] }
  0x40   :  { %443 = vmatpush.msrb.mxu1 %v292_v21  ;;  %483 = vmatpush.msrb.mxu3 %v293_v23  ;;  %v228_v55 = vld [vmem:[#allocation5 + $0x490] sm:$0xff]  ;;  %v101_v56 = vld [vmem:[#allocation5 + $0x98] sm:$0xff]  ;;  %v319_v13 = vld [vmem:[#allocation5 + $0x768] sm:$0xff] }
  0x41   :  { %424 = vmatpush.msrb.mxu0 %v156_v24  ;;  %464 = vmatpush.msrb.mxu2 %v157_v26  ;;  %v229_v57 = vld [vmem:[#allocation5 + $0x498] sm:$0xff]  ;;  %v92_v58 = vld [vmem:[#allocation5 + $0x50] sm:$0xff]  ;;  %v182_v14 = vld [vmem:[#allocation5 + $0x320] sm:$0xff] }
  0x42   :  { %444 = vmatpush.msrb.mxu1 %v284_v25  ;;  %484 = vmatpush.msrb.mxu3 %v285_v27  ;;  %v220_v59 = vld [vmem:[#allocation5 + $0x450] sm:$0xff]  ;;  %v93_v60 = vld [vmem:[#allocation5 + $0x58] sm:$0xff]  ;;  %v310_v15 = vld [vmem:[#allocation5 + $0x720] sm:$0xff] }
  0x43   :  { %425 = vmatpush.msrb.mxu0 %v148_v28  ;;  %465 = vmatpush.msrb.mxu2 %v149_v30  ;;  %v221_v61 = vld [vmem:[#allocation5 + $0x458] sm:$0xff]  ;;  %v84_v62 = vld [vmem:[#allocation5 + $0x10] sm:$0xff]  ;;  %v183_v16 = vld [vmem:[#allocation5 + $0x328] sm:$0xff] }
  0x44   :  { %445 = vmatpush.msrb.mxu1 %v276_v29  ;;  %485 = vmatpush.msrb.mxu3 %v277_v31  ;;  %v212_v63 = vld [vmem:[#allocation5 + $0x410] sm:$0xff]  ;;  %v85_v0 = vld [vmem:[#allocation5 + $0x18] sm:$0xff]  ;;  %v311_v17 = vld [vmem:[#allocation5 + $0x728] sm:$0xff] }
  0x45   :  { %426 = vmatpush.msrb.mxu0 %v140_v32  ;;  %466 = vmatpush.msrb.mxu2 %v141_v34  ;;  %v213_v1 = vld [vmem:[#allocation5 + $0x418] sm:$0xff]  ;;  %v174_v18 = vld [vmem:[#allocation5 + $0x2e0] sm:$0xff]  ;;  %v175_v20 = vld [vmem:[#allocation5 + $0x2e8] sm:$0xff] }
  0x46   :  { %446 = vmatpush.msrb.mxu1 %v268_v33  ;;  %486 = vmatpush.msrb.mxu3 %v269_v35  ;;  %v302_v19 = vld [vmem:[#allocation5 + $0x6e0] sm:$0xff]  ;;  %v303_v21 = vld [vmem:[#allocation5 + $0x6e8] sm:$0xff] }
  0x47   :  { %427 = vmatpush.msrb.mxu0 %v132_v36  ;;  %467 = vmatpush.msrb.mxu2 %v133_v38  ;;  %v166_v22 = vld [vmem:[#allocation5 + $0x2a0] sm:$0xff]  ;;  %v167_v24 = vld [vmem:[#allocation5 + $0x2a8] sm:$0xff] }
  0x48   :  { %447 = vmatpush.msrb.mxu1 %v260_v37  ;;  %487 = vmatpush.msrb.mxu3 %v261_v39  ;;  %v294_v23 = vld [vmem:[#allocation5 + $0x6a0] sm:$0xff]  ;;  %v295_v25 = vld [vmem:[#allocation5 + $0x6a8] sm:$0xff] }
  0x49   :  { %428 = vmatpush.msrb.mxu0 %v124_v40  ;;  %468 = vmatpush.msrb.mxu2 %v125_v42  ;;  %v158_v26 = vld [vmem:[#allocation5 + $0x260] sm:$0xff]  ;;  %v159_v28 = vld [vmem:[#allocation5 + $0x268] sm:$0xff] }
  0x4a   :  { %448 = vmatpush.msrb.mxu1 %v252_v41  ;;  %488 = vmatpush.msrb.mxu3 %v253_v43  ;;  %v286_v27 = vld [vmem:[#allocation5 + $0x660] sm:$0xff]  ;;  %v287_v29 = vld [vmem:[#allocation5 + $0x668] sm:$0xff] }
  0x4b   :  { %429 = vmatpush.msrb.mxu0 %v116_v44  ;;  %469 = vmatpush.msrb.mxu2 %v117_v46  ;;  %v150_v30 = vld [vmem:[#allocation5 + $0x220] sm:$0xff]  ;;  %v151_v32 = vld [vmem:[#allocation5 + $0x228] sm:$0xff] }
  0x4c   :  { %449 = vmatpush.msrb.mxu1 %v244_v45  ;;  %489 = vmatpush.msrb.mxu3 %v245_v47  ;;  %v278_v31 = vld [vmem:[#allocation5 + $0x620] sm:$0xff]  ;;  %v279_v33 = vld [vmem:[#allocation5 + $0x628] sm:$0xff] }
  0x4d   :  { %394 = vmatmul.f32.vlgmr.msra.gmra.mxu2 %v1193_v48  ;;  %414 = vmatmul.f32.vlgmr.msra.gmra.mxu3 %v1195_v49  ;;  %v142_v34 = vld [vmem:[#allocation5 + $0x1e0] sm:$0xff]  ;;  %v143_v36 = vld [vmem:[#allocation5 + $0x1e8] sm:$0xff] }
  0x4e   :  { %430 = vmatpush.msrb.mxu0 %v108_v50  ;;  %450 = vmatpush.msrb.mxu1 %v236_v51  ;;  %v270_v35 = vld [vmem:[#allocation5 + $0x5e0] sm:$0xff]  ;;  %v271_v37 = vld [vmem:[#allocation5 + $0x5e8] sm:$0xff] }
  0x4f   :  { %470 = vmatpush.msrb.mxu2 %v109_v52  ;;  %490 = vmatpush.msrb.mxu3 %v237_v53  ;;  %v134_v38 = vld [vmem:[#allocation5 + $0x1a0] sm:$0xff]  ;;  %v135_v40 = vld [vmem:[#allocation5 + $0x1a8] sm:$0xff] }
  0x50   :  { %354 = vmatmul.f32.vlgmr.msra.gmra.mxu0 %v1193_v48  ;;  %374 = vmatmul.f32.vlgmr.msra.gmra.mxu1 %v1195_v49  ;;  %v262_v39 = vld [vmem:[#allocation5 + $0x5a0] sm:$0xff]  ;;  %v263_v41 = vld [vmem:[#allocation5 + $0x5a8] sm:$0xff] }
  0x51   :  { %431 = vmatpush.msrb.mxu0 %v100_v54  ;;  %451 = vmatpush.msrb.mxu1 %v228_v55  ;;  %v126_v42 = vld [vmem:[#allocation5 + $0x160] sm:$0xff]  ;;  %v127_v44 = vld [vmem:[#allocation5 + $0x168] sm:$0xff] }
  0x52   :  { %471 = vmatpush.msrb.mxu2 %v101_v56  ;;  %491 = vmatpush.msrb.mxu3 %v229_v57  ;;  %v254_v43 = vld [vmem:[#allocation5 + $0x560] sm:$0xff]  ;;  %v255_v45 = vld [vmem:[#allocation5 + $0x568] sm:$0xff] }
  0x53   :  { %432 = vmatpush.msrb.mxu0 %v92_v58  ;;  %452 = vmatpush.msrb.mxu1 %v220_v59  ;;  %v118_v46 = vld [vmem:[#allocation5 + $0x120] sm:$0xff]  ;;  %v119_v50 = vld [vmem:[#allocation5 + $0x128] sm:$0xff] }
  0x54   :  { %472 = vmatpush.msrb.mxu2 %v93_v60  ;;  %492 = vmatpush.msrb.mxu3 %v221_v61  ;;  %v246_v47 = vld [vmem:[#allocation5 + $0x520] sm:$0xff]  ;;  %v247_v51 = vld [vmem:[#allocation5 + $0x528] sm:$0xff] }
  0x55   :  { %433 = vmatpush.msrb.mxu0 %v84_v62  ;;  %453 = vmatpush.msrb.mxu1 %v212_v63  ;;  %v110_v52 = vld [vmem:[#allocation5 + $0xe0] sm:$0xff]  ;;  %v111_v54 = vld [vmem:[#allocation5 + $0xe8] sm:$0xff] }
  0x56   :  { %473 = vmatpush.msrb.mxu2 %v85_v0  ;;  %493 = vmatpush.msrb.mxu3 %v213_v1  ;;  %v238_v53 = vld [vmem:[#allocation5 + $0x4e0] sm:$0xff]  ;;  %v239_v55 = vld [vmem:[#allocation5 + $0x4e8] sm:$0xff] }
  0x57   :  { %474 = vmatmul.f32.vlgmr.msrb.gmra.mxu2 %v1193_v48  ;;  %494 = vmatmul.f32.vlgmr.msrb.gmra.mxu3 %v1195_v49  ;;  %v102_v56 = vld [vmem:[#allocation5 + $0xa0] sm:$0xff]  ;;  %v103_v58 = vld [vmem:[#allocation5 + $0xa8] sm:$0xff] }
  0x58   :  { %498 = vmatpush.msra.mxu0 %v206_v2  ;;  %518 = vmatpush.msra.mxu1 %v334_v3  ;;  %v230_v57 = vld [vmem:[#allocation5 + $0x4a0] sm:$0xff]  ;;  %v231_v59 = vld [vmem:[#allocation5 + $0x4a8] sm:$0xff] }
  0x59   :  { %538 = vmatpush.msra.mxu2 %v207_v4  ;;  %558 = vmatpush.msra.mxu3 %v335_v5  ;;  %v94_v60 = vld [vmem:[#allocation5 + $0x60] sm:$0xff]  ;;  %v95_v62 = vld [vmem:[#allocation5 + $0x68] sm:$0xff]  ;;  %v208_v4 = vld [vmem:[#allocation5 + $0x3f0] sm:$0xff] }
  0x5a   :  { %434 = vmatmul.f32.vlgmr.msrb.gmra.mxu0 %v1193_v48  ;;  %454 = vmatmul.f32.vlgmr.msrb.gmra.mxu1 %v1195_v49  ;;  %v222_v61 = vld [vmem:[#allocation5 + $0x460] sm:$0xff]  ;;  %v223_v63 = vld [vmem:[#allocation5 + $0x468] sm:$0xff]  ;;  %v336_v5 = vld [vmem:[#allocation5 + $0x7f0] sm:$0xff] }
  0x5b   :  { %499 = vmatpush.msra.mxu0 %v198_v6  ;;  %519 = vmatpush.msra.mxu1 %v326_v7  ;;  %v86_v0 = vld [vmem:[#allocation5 + $0x20] sm:$0xff]  ;;  %v87_v2 = vld [vmem:[#allocation5 + $0x28] sm:$0xff]  ;;  %v209_v6 = vld [vmem:[#allocation5 + $0x3f8] sm:$0xff] }
  0x5c   :  { %539 = vmatpush.msra.mxu2 %v199_v8  ;;  %559 = vmatpush.msra.mxu3 %v327_v9  ;;  %v214_v1 = vld [vmem:[#allocation5 + $0x420] sm:$0xff]  ;;  %v215_v3 = vld [vmem:[#allocation5 + $0x428] sm:$0xff]  ;;  %v337_v7 = vld [vmem:[#allocation5 + $0x7f8] sm:$0xff] }
  0x5d   :  { %500 = vmatpush.msra.mxu0 %v190_v10  ;;  %520 = vmatpush.msra.mxu1 %v318_v11  ;;  %v200_v8 = vld [vmem:[#allocation5 + $0x3b0] sm:$0xff]  ;;  %v201_v10 = vld [vmem:[#allocation5 + $0x3b8] sm:$0xff] }
  0x5e   :  { %540 = vmatpush.msra.mxu2 %v191_v12  ;;  %560 = vmatpush.msra.mxu3 %v319_v13  ;;  %v328_v9 = vld [vmem:[#allocation5 + $0x7b0] sm:$0xff]  ;;  %v329_v11 = vld [vmem:[#allocation5 + $0x7b8] sm:$0xff] }
  0x5f   :  { %501 = vmatpush.msra.mxu0 %v182_v14  ;;  %521 = vmatpush.msra.mxu1 %v310_v15  ;;  %v192_v12 = vld [vmem:[#allocation5 + $0x370] sm:$0xff]  ;;  %v193_v14 = vld [vmem:[#allocation5 + $0x378] sm:$0xff] }
  0x60   :  { %541 = vmatpush.msra.mxu2 %v183_v16  ;;  %561 = vmatpush.msra.mxu3 %v311_v17  ;;  %v320_v13 = vld [vmem:[#allocation5 + $0x770] sm:$0xff]  ;;  %v321_v15 = vld [vmem:[#allocation5 + $0x778] sm:$0xff] }
  0x61   :  { %502 = vmatpush.msra.mxu0 %v174_v18  ;;  %522 = vmatpush.msra.mxu1 %v302_v19  ;;  %v184_v16 = vld [vmem:[#allocation5 + $0x330] sm:$0xff]  ;;  %v185_v18 = vld [vmem:[#allocation5 + $0x338] sm:$0xff] }
  0x62   :  { %542 = vmatpush.msra.mxu2 %v175_v20  ;;  %562 = vmatpush.msra.mxu3 %v303_v21  ;;  %v312_v17 = vld [vmem:[#allocation5 + $0x730] sm:$0xff]  ;;  %v313_v19 = vld [vmem:[#allocation5 + $0x738] sm:$0xff] }
  0x63   :  { %503 = vmatpush.msra.mxu0 %v166_v22  ;;  %523 = vmatpush.msra.mxu1 %v294_v23  ;;  %v176_v20 = vld [vmem:[#allocation5 + $0x2f0] sm:$0xff]  ;;  %v177_v22 = vld [vmem:[#allocation5 + $0x2f8] sm:$0xff] }
  0x64   :  { %543 = vmatpush.msra.mxu2 %v167_v24  ;;  %563 = vmatpush.msra.mxu3 %v295_v25  ;;  %v304_v21 = vld [vmem:[#allocation5 + $0x6f0] sm:$0xff]  ;;  %v305_v23 = vld [vmem:[#allocation5 + $0x6f8] sm:$0xff] }
  0x65   :  { %504 = vmatpush.msra.mxu0 %v158_v26  ;;  %524 = vmatpush.msra.mxu1 %v286_v27  ;;  %v168_v24 = vld [vmem:[#allocation5 + $0x2b0] sm:$0xff]  ;;  %v169_v26 = vld [vmem:[#allocation5 + $0x2b8] sm:$0xff] }
  0x66   :  { %544 = vmatpush.msra.mxu2 %v159_v28  ;;  %564 = vmatpush.msra.mxu3 %v287_v29  ;;  %v296_v25 = vld [vmem:[#allocation5 + $0x6b0] sm:$0xff]  ;;  %v297_v27 = vld [vmem:[#allocation5 + $0x6b8] sm:$0xff] }
  0x67   :  { %505 = vmatpush.msra.mxu0 %v150_v30  ;;  %525 = vmatpush.msra.mxu1 %v278_v31  ;;  %v160_v28 = vld [vmem:[#allocation5 + $0x270] sm:$0xff]  ;;  %v161_v30 = vld [vmem:[#allocation5 + $0x278] sm:$0xff] }
  0x68   :  { %545 = vmatpush.msra.mxu2 %v151_v32  ;;  %565 = vmatpush.msra.mxu3 %v279_v33  ;;  %v288_v29 = vld [vmem:[#allocation5 + $0x670] sm:$0xff]  ;;  %v289_v31 = vld [vmem:[#allocation5 + $0x678] sm:$0xff] }
  0x69   :  { %506 = vmatpush.msra.mxu0 %v142_v34  ;;  %526 = vmatpush.msra.mxu1 %v270_v35  ;;  %v152_v32 = vld [vmem:[#allocation5 + $0x230] sm:$0xff]  ;;  %v153_v34 = vld [vmem:[#allocation5 + $0x238] sm:$0xff] }
  0x6a   :  { %546 = vmatpush.msra.mxu2 %v143_v36  ;;  %566 = vmatpush.msra.mxu3 %v271_v37  ;;  %v280_v33 = vld [vmem:[#allocation5 + $0x630] sm:$0xff]  ;;  %v281_v35 = vld [vmem:[#allocation5 + $0x638] sm:$0xff] }
  0x6b   :  { %507 = vmatpush.msra.mxu0 %v134_v38  ;;  %527 = vmatpush.msra.mxu1 %v262_v39  ;;  %v144_v36 = vld [vmem:[#allocation5 + $0x1f0] sm:$0xff]  ;;  %v145_v38 = vld [vmem:[#allocation5 + $0x1f8] sm:$0xff] }
  0x6c   :  { %547 = vmatpush.msra.mxu2 %v135_v40  ;;  %567 = vmatpush.msra.mxu3 %v263_v41  ;;  %v272_v37 = vld [vmem:[#allocation5 + $0x5f0] sm:$0xff]  ;;  %v273_v39 = vld [vmem:[#allocation5 + $0x5f8] sm:$0xff] }
  0x6d   :  { %508 = vmatpush.msra.mxu0 %v126_v42  ;;  %528 = vmatpush.msra.mxu1 %v254_v43  ;;  %v136_v40 = vld [vmem:[#allocation5 + $0x1b0] sm:$0xff]  ;;  %v137_v42 = vld [vmem:[#allocation5 + $0x1b8] sm:$0xff] }
  0x6e   :  { %548 = vmatpush.msra.mxu2 %v127_v44  ;;  %568 = vmatpush.msra.mxu3 %v255_v45  ;;  %v264_v41 = vld [vmem:[#allocation5 + $0x5b0] sm:$0xff]  ;;  %v265_v43 = vld [vmem:[#allocation5 + $0x5b8] sm:$0xff] }
  0x6f   :  { %509 = vmatpush.msra.mxu0 %v118_v46  ;;  %529 = vmatpush.msra.mxu1 %v246_v47  ;;  %v128_v44 = vld [vmem:[#allocation5 + $0x170] sm:$0xff]  ;;  %v129_v46 = vld [vmem:[#allocation5 + $0x178] sm:$0xff] }
  0x70   :  { %549 = vmatpush.msra.mxu2 %v119_v50  ;;  %569 = vmatpush.msra.mxu3 %v247_v51  ;;  %v256_v45 = vld [vmem:[#allocation5 + $0x570] sm:$0xff]  ;;  %v257_v47 = vld [vmem:[#allocation5 + $0x578] sm:$0xff] }
  0x71   :  { %510 = vmatpush.msra.mxu0 %v110_v52  ;;  %530 = vmatpush.msra.mxu1 %v238_v53  ;;  %v120_v50 = vld [vmem:[#allocation5 + $0x130] sm:$0xff]  ;;  %v121_v52 = vld [vmem:[#allocation5 + $0x138] sm:$0xff] }
  0x72   :  { %550 = vmatpush.msra.mxu2 %v111_v54  ;;  %570 = vmatpush.msra.mxu3 %v239_v55  ;;  %v248_v51 = vld [vmem:[#allocation5 + $0x530] sm:$0xff]  ;;  %v249_v53 = vld [vmem:[#allocation5 + $0x538] sm:$0xff] }
  0x73   :  { %511 = vmatpush.msra.mxu0 %v102_v56  ;;  %531 = vmatpush.msra.mxu1 %v230_v57  ;;  %v112_v54 = vld [vmem:[#allocation5 + $0xf0] sm:$0xff]  ;;  %v113_v56 = vld [vmem:[#allocation5 + $0xf8] sm:$0xff] }
  0x74   :  { %551 = vmatpush.msra.mxu2 %v103_v58  ;;  %571 = vmatpush.msra.mxu3 %v231_v59  ;;  %v240_v55 = vld [vmem:[#allocation5 + $0x4f0] sm:$0xff]  ;;  %v241_v57 = vld [vmem:[#allocation5 + $0x4f8] sm:$0xff] }
  0x75   :  { %512 = vmatpush.msra.mxu0 %v94_v60  ;;  %532 = vmatpush.msra.mxu1 %v222_v61  ;;  %v104_v58 = vld [vmem:[#allocation5 + $0xb0] sm:$0xff]  ;;  %v105_v60 = vld [vmem:[#allocation5 + $0xb8] sm:$0xff] }
  0x76   :  { %552 = vmatpush.msra.mxu2 %v95_v62  ;;  %572 = vmatpush.msra.mxu3 %v223_v63  ;;  %v232_v59 = vld [vmem:[#allocation5 + $0x4b0] sm:$0xff]  ;;  %v233_v61 = vld [vmem:[#allocation5 + $0x4b8] sm:$0xff] }
  0x77   :  { %513 = vmatpush.msra.mxu0 %v86_v0  ;;  %533 = vmatpush.msra.mxu1 %v214_v1  ;;  %v96_v62 = vld [vmem:[#allocation5 + $0x70] sm:$0xff]  ;;  %v97_v0 = vld [vmem:[#allocation5 + $0x78] sm:$0xff] }
  0x78   :  { %553 = vmatpush.msra.mxu2 %v87_v2  ;;  %573 = vmatpush.msra.mxu3 %v215_v3  ;;  %v224_v63 = vld [vmem:[#allocation5 + $0x470] sm:$0xff]  ;;  %v225_v1 = vld [vmem:[#allocation5 + $0x478] sm:$0xff] }
  0x79   :  { %514 = vmatmul.f32.vlgmr.msra.gmra.mxu0 %v1193_v48  ;;  %534 = vmatmul.f32.vlgmr.msra.gmra.mxu1 %v1195_v49  ;;  %v88_v2 = vld [vmem:[#allocation5 + $0x30] sm:$0xff] }
  0x7a   :  { %554 = vmatmul.f32.vlgmr.msra.gmra.mxu2 %v1193_v48  ;;  %574 = vmatmul.f32.vlgmr.msra.gmra.mxu3 %v1195_v49  ;;  %v216_v3 = vld [vmem:[#allocation5 + $0x430] sm:$0xff] }
  0x7b   :  { %578 = vmatpush.msrb.mxu0 %v208_v4  ;;  %598 = vmatpush.msrb.mxu1 %v336_v5  ;;  %v89_v4 = vld [vmem:[#allocation5 + $0x38] sm:$0xff] }
  0x7c   :  { %618 = vmatpush.msrb.mxu2 %v209_v6  ;;  %638 = vmatpush.msrb.mxu3 %v337_v7  ;;  %v217_v5 = vld [vmem:[#allocation5 + $0x438] sm:$0xff]  ;;  %v707_v6 = vld [vmem:[#allocation8 + $0x78] sm:$0xff] }
  0x7d   :  { %579 = vmatpush.msrb.mxu0 %v200_v8  ;;  %599 = vmatpush.msrb.mxu1 %v328_v9  ;;  %v739_v7 = vld [vmem:[#allocation8 + $0x178] sm:$0xff] }
  0x7e   :  { %619 = vmatpush.msrb.mxu2 %v201_v10  ;;  %639 = vmatpush.msrb.mxu3 %v329_v11  ;;  %v723_v8 = vld [vmem:[#allocation8 + $0xf8] sm:$0xff]  ;;  %v706_v10 = vld [vmem:[#allocation8 + $0x70] sm:$0xff] }
  0x7f   :  { %580 = vmatpush.msrb.mxu0 %v192_v12  ;;  %600 = vmatpush.msrb.mxu1 %v320_v13  ;;  %v755_v9 = vld [vmem:[#allocation8 + $0x1f8] sm:$0xff]  ;;  %v738_v11 = vld [vmem:[#allocation8 + $0x170] sm:$0xff] }
  0x80   :  { %620 = vmatpush.msrb.mxu2 %v193_v14  ;;  %640 = vmatpush.msrb.mxu3 %v321_v15  ;;  %v722_v12 = vld [vmem:[#allocation8 + $0xf0] sm:$0xff]  ;;  %v705_v14 = vld [vmem:[#allocation8 + $0x68] sm:$0xff] }
  0x81   :  { %581 = vmatpush.msrb.mxu0 %v184_v16  ;;  %601 = vmatpush.msrb.mxu1 %v312_v17  ;;  %v754_v13 = vld [vmem:[#allocation8 + $0x1f0] sm:$0xff]  ;;  %v737_v15 = vld [vmem:[#allocation8 + $0x168] sm:$0xff] }
  0x82   :  { %621 = vmatpush.msrb.mxu2 %v185_v18  ;;  %641 = vmatpush.msrb.mxu3 %v313_v19  ;;  %v721_v16 = vld [vmem:[#allocation8 + $0xe8] sm:$0xff]  ;;  %v704_v18 = vld [vmem:[#allocation8 + $0x60] sm:$0xff] }
  0x83   :  { %582 = vmatpush.msrb.mxu0 %v176_v20  ;;  %602 = vmatpush.msrb.mxu1 %v304_v21  ;;  %v753_v17 = vld [vmem:[#allocation8 + $0x1e8] sm:$0xff]  ;;  %v736_v19 = vld [vmem:[#allocation8 + $0x160] sm:$0xff]  ;;  %v703_v20 = vld [vmem:[#allocation8 + $0x58] sm:$0xff] }
  0x84   :  { %622 = vmatpush.msrb.mxu2 %v177_v22  ;;  %642 = vmatpush.msrb.mxu3 %v305_v23  ;;  %v735_v21 = vld [vmem:[#allocation8 + $0x158] sm:$0xff] }
  0x85   :  { %583 = vmatpush.msrb.mxu0 %v168_v24  ;;  %603 = vmatpush.msrb.mxu1 %v296_v25  ;;  %v719_v22 = vld [vmem:[#allocation8 + $0xd8] sm:$0xff]  ;;  %v702_v24 = vld [vmem:[#allocation8 + $0x50] sm:$0xff] }
  0x86   :  { %623 = vmatpush.msrb.mxu2 %v169_v26  ;;  %643 = vmatpush.msrb.mxu3 %v297_v27  ;;  %v751_v23 = vld [vmem:[#allocation8 + $0x1d8] sm:$0xff]  ;;  %v734_v25 = vld [vmem:[#allocation8 + $0x150] sm:$0xff] }
  0x87   :  { %584 = vmatpush.msrb.mxu0 %v160_v28  ;;  %604 = vmatpush.msrb.mxu1 %v288_v29  ;;  %v718_v26 = vld [vmem:[#allocation8 + $0xd0] sm:$0xff]  ;;  %v701_v28 = vld [vmem:[#allocation8 + $0x48] sm:$0xff] }
  0x88   :  { %624 = vmatpush.msrb.mxu2 %v161_v30  ;;  %644 = vmatpush.msrb.mxu3 %v289_v31  ;;  %v750_v27 = vld [vmem:[#allocation8 + $0x1d0] sm:$0xff]  ;;  %v733_v29 = vld [vmem:[#allocation8 + $0x148] sm:$0xff]  ;;  %v700_v30 = vld [vmem:[#allocation8 + $0x40] sm:$0xff] }
  0x89   :  { %585 = vmatpush.msrb.mxu0 %v152_v32  ;;  %605 = vmatpush.msrb.mxu1 %v280_v33  ;;  %v732_v31 = vld [vmem:[#allocation8 + $0x140] sm:$0xff]  ;;  %v699_v32 = vld [vmem:[#allocation8 + $0x38] sm:$0xff]  ;;  %v698_v33 = vld [vmem:[#allocation8 + $0x30] sm:$0xff] }
  0x8a   :  { %625 = vmatpush.msrb.mxu2 %v153_v34  ;;  %645 = vmatpush.msrb.mxu3 %v281_v35  ;;  %v717_v34 = vld [vmem:[#allocation8 + $0xc8] sm:$0xff]  ;;  %v731_v35 = vld [vmem:[#allocation8 + $0x138] sm:$0xff] }
  0x8b   :  { %586 = vmatpush.msrb.mxu0 %v144_v36  ;;  %606 = vmatpush.msrb.mxu1 %v272_v37  ;;  %v749_v36 = vld [vmem:[#allocation8 + $0x1c8] sm:$0xff] }
  0x8c   :  { %626 = vmatpush.msrb.mxu2 %v145_v38  ;;  %646 = vmatpush.msrb.mxu3 %v273_v39  ;;  %v697_v37 = vld [vmem:[#allocation8 + $0x28] sm:$0xff]  ;;  %v716_v38 = vld [vmem:[#allocation8 + $0xc0] sm:$0xff]  ;;  %v730_v39 = vld [vmem:[#allocation8 + $0x130] sm:$0xff] }
  0x8d   :  { %587 = vmatpush.msrb.mxu0 %v136_v40  ;;  %607 = vmatpush.msrb.mxu1 %v264_v41  ;;  %v748_v40 = vld [vmem:[#allocation8 + $0x1c0] sm:$0xff] }
  0x8e   :  { %627 = vmatpush.msrb.mxu2 %v137_v42  ;;  %647 = vmatpush.msrb.mxu3 %v265_v43  ;;  %v696_v41 = vld [vmem:[#allocation8 + $0x20] sm:$0xff]  ;;  %v715_v42 = vld [vmem:[#allocation8 + $0xb8] sm:$0xff]  ;;  %v729_v43 = vld [vmem:[#allocation8 + $0x128] sm:$0xff] }
  0x8f   :  { %588 = vmatpush.msrb.mxu0 %v128_v44  ;;  %608 = vmatpush.msrb.mxu1 %v256_v45  ;;  %v747_v44 = vld [vmem:[#allocation8 + $0x1b8] sm:$0xff] }
  0x90   :  { %628 = vmatpush.msrb.mxu2 %v129_v46  ;;  %648 = vmatpush.msrb.mxu3 %v257_v47  ;;  %v695_v45 = vld [vmem:[#allocation8 + $0x18] sm:$0xff]  ;;  %v714_v46 = vld [vmem:[#allocation8 + $0xb0] sm:$0xff]  ;;  %v728_v47 = vld [vmem:[#allocation8 + $0x120] sm:$0xff] }
  0x91   :  { %589 = vmatpush.msrb.mxu0 %v120_v50  ;;  %609 = vmatpush.msrb.mxu1 %v248_v51  ;;  %v746_v50 = vld [vmem:[#allocation8 + $0x1b0] sm:$0xff] }
  0x92   :  { %629 = vmatpush.msrb.mxu2 %v121_v52  ;;  %649 = vmatpush.msrb.mxu3 %v249_v53  ;;  %v694_v51 = vld [vmem:[#allocation8 + $0x10] sm:$0xff]  ;;  %v713_v52 = vld [vmem:[#allocation8 + $0xa8] sm:$0xff]  ;;  %v727_v53 = vld [vmem:[#allocation8 + $0x118] sm:$0xff] }
  0x93   :  { %590 = vmatpush.msrb.mxu0 %v112_v54  ;;  %610 = vmatpush.msrb.mxu1 %v240_v55  ;;  %v745_v54 = vld [vmem:[#allocation8 + $0x1a8] sm:$0xff] }
  0x94   :  { %630 = vmatpush.msrb.mxu2 %v113_v56  ;;  %650 = vmatpush.msrb.mxu3 %v241_v57  ;;  %v693_v55 = vld [vmem:[#allocation8 + $0x8] sm:$0xff]  ;;  %v712_v56 = vld [vmem:[#allocation8 + $0xa0] sm:$0xff]  ;;  %v726_v57 = vld [vmem:[#allocation8 + $0x110] sm:$0xff] }
  0x95   :  { %591 = vmatpush.msrb.mxu0 %v104_v58  ;;  %611 = vmatpush.msrb.mxu1 %v232_v59  ;;  %v744_v58 = vld [vmem:[#allocation8 + $0x1a0] sm:$0xff] }
  0x96   :  { %631 = vmatpush.msrb.mxu2 %v105_v60  ;;  %651 = vmatpush.msrb.mxu3 %v233_v61  ;;  %v692_v59 = vld [vmem:[#allocation8] sm:$0xff]  ;;  %v711_v60 = vld [vmem:[#allocation8 + $0x98] sm:$0xff]  ;;  %v725_v61 = vld [vmem:[#allocation8 + $0x108] sm:$0xff] }
  0x97   :  { %592 = vmatpush.msrb.mxu0 %v96_v62  ;;  %612 = vmatpush.msrb.mxu1 %v224_v63  ;;  %v743_v62 = vld [vmem:[#allocation8 + $0x198] sm:$0xff] }
  0x98   :  { %632 = vmatpush.msrb.mxu2 %v97_v0  ;;  %652 = vmatpush.msrb.mxu3 %v225_v1  ;;  %v771_v63 = vld [vmem:[#allocation8 + $0x278] sm:$0xff]  ;;  %v710_v0 = vld [vmem:[#allocation8 + $0x90] sm:$0xff]  ;;  %v724_v1 = vld [vmem:[#allocation8 + $0x100] sm:$0xff] }
  0x99   :  { %593 = vmatpush.msrb.mxu0 %v88_v2  ;;  %613 = vmatpush.msrb.mxu1 %v216_v3  ;;  %v742_v2 = vld [vmem:[#allocation8 + $0x190] sm:$0xff] }
  0x9a   :  { %633 = vmatpush.msrb.mxu2 %v89_v4  ;;  %653 = vmatpush.msrb.mxu3 %v217_v5  ;;  %v770_v3 = vld [vmem:[#allocation8 + $0x270] sm:$0xff]  ;;  %v709_v4 = vld [vmem:[#allocation8 + $0x88] sm:$0xff] }
  0x9b   :  { %594 = vmatmul.f32.vlgmr.msrb.gmra.mxu0 %v1193_v48  ;;  %614 = vmatmul.f32.vlgmr.msrb.gmra.mxu1 %v1195_v49  ;;  %v741_v5 = vld [vmem:[#allocation8 + $0x188] sm:$0xff] }
  0x9c   :  { %634 = vmatmul.f32.vlgmr.msrb.gmra.mxu2 %v1193_v48  ;;  %654 = vmatmul.f32.vlgmr.msrb.gmra.mxu3 %v1195_v49  ;;  %v720_v48 = vld [vmem:[#allocation8 + $0xe0] sm:$0xff] }
  0x9d   :  { %824 = vmatpush.msra.mxu0 %v707_v6  ;;  %864 = vmatpush.msra.mxu2 %v739_v7  ;;  %v752_v49 = vld [vmem:[#allocation8 + $0x1e0] sm:$0xff]  ;;  %v769_v6 = vld [vmem:[#allocation8 + $0x268] sm:$0xff] }
  0x9e   :  { %844 = vmatpush.msra.mxu1 %v723_v8  ;;  %884 = vmatpush.msra.mxu3 %v755_v9  ;;  %v708_v7 = vld [vmem:[#allocation8 + $0x80] sm:$0xff]  ;;  %v787_v9 = vld [vmem:[#allocation8 + $0x2f8] sm:$0xff] }
  0x9f   :  { %825 = vmatpush.msra.mxu0 %v706_v10  ;;  %865 = vmatpush.msra.mxu2 %v738_v11  ;;  %v740_v8 = vld [vmem:[#allocation8 + $0x180] sm:$0xff]  ;;  %v786_v11 = vld [vmem:[#allocation8 + $0x2f0] sm:$0xff] }
  0xa0   :  { %845 = vmatpush.msra.mxu1 %v722_v12  ;;  %885 = vmatpush.msra.mxu3 %v754_v13  ;;  %v768_v10 = vld [vmem:[#allocation8 + $0x260] sm:$0xff]  ;;  %v767_v12 = vld [vmem:[#allocation8 + $0x258] sm:$0xff]  ;;  %v785_v13 = vld [vmem:[#allocation8 + $0x2e8] sm:$0xff] }
  0xa1   :  { %826 = vmatpush.msra.mxu0 %v705_v14  ;;  %866 = vmatpush.msra.mxu2 %v737_v15  ;;  %v766_v14 = vld [vmem:[#allocation8 + $0x250] sm:$0xff]  ;;  %v1213_v15 = vld [vmem:[#allocation7] sm:$0xff] }
  0xa2   :  { %846 = vmatpush.msra.mxu1 %v721_v16  ;;  %886 = vmatpush.msra.mxu3 %v753_v17  ;;  %v784_v16 = vld [vmem:[#allocation8 + $0x2e0] sm:$0xff]  ;;  %v660_v17 = vperm.slane %v1213_v15, 0 }
  0xa3   :  { %827 = vmatpush.msra.mxu0 %v704_v18  ;;  %867 = vmatpush.msra.mxu2 %v736_v19  ;;  %v765_v18 = vld [vmem:[#allocation8 + $0x248] sm:$0xff] }
  0xa4   :  { %847 = vmatpush.msra.mxu1 %v720_v48  ;;  %887 = vmatpush.msra.mxu3 %v752_v49  ;;  %v783_v49 = vld [vmem:[#allocation8 + $0x2d8] sm:$0xff] }
  0xa5   :  { %828 = vmatpush.msra.mxu0 %v703_v20  ;;  %868 = vmatpush.msra.mxu2 %v735_v21  ;;  %v764_v21 = vld [vmem:[#allocation8 + $0x240] sm:$0xff] }
  0xa6   :  { %848 = vmatpush.msra.mxu1 %v719_v22  ;;  %888 = vmatpush.msra.mxu3 %v751_v23  ;;  %v661_v22 = vperm.slane %v1213_v15, 1  ;;  %v782_v23 = vld [vmem:[#allocation8 + $0x2d0] sm:$0xff] }
  0xa7   :  { %829 = vmatpush.msra.mxu0 %v702_v24  ;;  %869 = vmatpush.msra.mxu2 %v734_v25 }
  0xa8   :  { %849 = vmatpush.msra.mxu1 %v718_v26  ;;  %889 = vmatpush.msra.mxu3 %v750_v27  ;;  %v763_v27 = vld [vmem:[#allocation8 + $0x238] sm:$0xff] }
  0xa9   :  { %830 = vmatpush.msra.mxu0 %v701_v28  ;;  %870 = vmatpush.msra.mxu2 %v733_v29  ;;  %v781_v29 = vld [vmem:[#allocation8 + $0x2c8] sm:$0xff] }
  0xaa   :  { %850 = vmatpush.msra.mxu1 %v717_v34  ;;  %890 = vmatpush.msra.mxu3 %v749_v36  ;;  %v761_v34 = vld [vmem:[#allocation8 + $0x228] sm:$0xff]  ;;  %v779_v36 = vld [vmem:[#allocation8 + $0x2b8] sm:$0xff] }
  0xab   :  { %831 = vmatpush.msra.mxu0 %v700_v30  ;;  %871 = vmatpush.msra.mxu2 %v732_v31  ;;  %v762_v31 = vld [vmem:[#allocation8 + $0x230] sm:$0xff] }
  0xac   :  { %851 = vmatpush.msra.mxu1 %v716_v38  ;;  %891 = vmatpush.msra.mxu3 %v748_v40  ;;  %v760_v38 = vld [vmem:[#allocation8 + $0x220] sm:$0xff] }
  0xad   :  { %832 = vmatpush.msra.mxu0 %v699_v32  ;;  %872 = vmatpush.msra.mxu2 %v731_v35 }
  0xae   :  { %852 = vmatpush.msra.mxu1 %v715_v42  ;;  %892 = vmatpush.msra.mxu3 %v747_v44  ;;  %v663_v42 = vperm.slane %v1213_v15, 3  ;;  %v778_v44 = vld [vmem:[#allocation8 + $0x2b0] sm:$0xff] }
  0xaf   :  { %833 = vmatpush.msra.mxu0 %v698_v33  ;;  %873 = vmatpush.msra.mxu2 %v730_v39  ;;  %v780_v33 = vld [vmem:[#allocation8 + $0x2c0] sm:$0xff] }
  0xb0   :  { %853 = vmatpush.msra.mxu1 %v714_v46  ;;  %893 = vmatpush.msra.mxu3 %v746_v50 }
  0xb1   :  { %834 = vmatpush.msra.mxu0 %v697_v37  ;;  %874 = vmatpush.msra.mxu2 %v729_v43  ;;  %v662_v37 = vperm.slane %v1213_v15, 2  ;;  %v759_v43 = vld [vmem:[#allocation8 + $0x218] sm:$0xff] }
  0xb2   :  { %854 = vmatpush.msra.mxu1 %v713_v52  ;;  %894 = vmatpush.msra.mxu3 %v745_v54  ;;  %v777_v52 = vld [vmem:[#allocation8 + $0x2a8] sm:$0xff] }
  0xb3   :  { %835 = vmatpush.msra.mxu0 %v696_v41  ;;  %875 = vmatpush.msra.mxu2 %v728_v47  ;;  %v757_v54 = vld [vmem:[#allocation8 + $0x208] sm:$0xff] }
  0xb4   :  { %855 = vmatpush.msra.mxu1 %v712_v56  ;;  %895 = vmatpush.msra.mxu3 %v744_v58  ;;  %v756_v58 = vld [vmem:[#allocation8 + $0x200] sm:$0xff] }
  0xb5   :  { %836 = vmatpush.msra.mxu0 %v695_v45  ;;  %876 = vmatpush.msra.mxu2 %v727_v53 }
  0xb6   :  { %856 = vmatpush.msra.mxu1 %v711_v60  ;;  %896 = vmatpush.msra.mxu3 %v743_v62  ;;  %v803_v60 = vld [vmem:[#allocation8 + $0x378] sm:$0xff]  ;;  %v802_v62 = vld [vmem:[#allocation8 + $0x370] sm:$0xff] }
  0xb7   :  { %837 = vmatpush.msra.mxu0 %v694_v51  ;;  %877 = vmatpush.msra.mxu2 %v726_v57  ;;  %v758_v51 = vld [vmem:[#allocation8 + $0x210] sm:$0xff] }
  0xb8   :  { %857 = vmatpush.msra.mxu1 %v710_v0  ;;  %897 = vmatpush.msra.mxu3 %v742_v2  ;;  %v801_v0 = vld [vmem:[#allocation8 + $0x368] sm:$0xff]  ;;  %v819_v2 = vld [vmem:[#allocation8 + $0x3f8] sm:$0xff] }
  0xb9   :  { %838 = vmatpush.msra.mxu0 %v693_v55  ;;  %878 = vmatpush.msra.mxu2 %v725_v61  ;;  %v776_v55 = vld [vmem:[#allocation8 + $0x2a0] sm:$0xff]  ;;  %v774_v61 = vld [vmem:[#allocation8 + $0x290] sm:$0xff] }
  0xba   :  { %858 = vmatpush.msra.mxu1 %v709_v4  ;;  %898 = vmatpush.msra.mxu3 %v741_v5  ;;  %v818_v4 = vld [vmem:[#allocation8 + $0x3f0] sm:$0xff]  ;;  %v817_v5 = vld [vmem:[#allocation8 + $0x3e8] sm:$0xff] }
  0xbb   :  { %839 = vmatpush.msra.mxu0 %v692_v59  ;;  %879 = vmatpush.msra.mxu2 %v724_v1  ;;  %v775_v59 = vld [vmem:[#allocation8 + $0x298] sm:$0xff]  ;;  %v772_v1 = vld [vmem:[#allocation8 + $0x280] sm:$0xff] }
  0xbc   :  { %859 = vmatpush.msra.mxu1 %v708_v7  ;;  %899 = vmatpush.msra.mxu3 %v740_v8  ;;  %v816_v7 = vld [vmem:[#allocation8 + $0x3e0] sm:$0xff]  ;;  %v798_v8 = vld [vmem:[#allocation8 + $0x350] sm:$0xff] }
  0xbd   :  { %904 = vmatpush.msrb.mxu0 %v771_v63  ;;  %944 = vmatpush.msrb.mxu2 %v803_v60  ;;  %v773_v63 = vld [vmem:[#allocation8 + $0x288] sm:$0xff] }
  0xbe   :  { %924 = vmatpush.msrb.mxu1 %v787_v9  ;;  %964 = vmatpush.msrb.mxu3 %v819_v2  ;;  %v815_v9 = vld [vmem:[#allocation8 + $0x3d8] sm:$0xff] }
  0xbf   :  { %905 = vmatpush.msrb.mxu0 %v770_v3  ;;  %945 = vmatpush.msrb.mxu2 %v802_v62  ;;  %v800_v3 = vld [vmem:[#allocation8 + $0x360] sm:$0xff] }
  0xc0   :  { %925 = vmatpush.msrb.mxu1 %v786_v11  ;;  %965 = vmatpush.msrb.mxu3 %v818_v4  ;;  %v814_v11 = vld [vmem:[#allocation8 + $0x3d0] sm:$0xff] }
  0xc1   :  { %906 = vmatpush.msrb.mxu0 %v769_v6  ;;  %946 = vmatpush.msrb.mxu2 %v801_v0  ;;  %v799_v6 = vld [vmem:[#allocation8 + $0x358] sm:$0xff] }
  0xc2   :  { %926 = vmatpush.msrb.mxu1 %v785_v13  ;;  %966 = vmatpush.msrb.mxu3 %v817_v5  ;;  %v813_v13 = vld [vmem:[#allocation8 + $0x3c8] sm:$0xff] }
  0xc3   :  { %907 = vmatpush.msrb.mxu0 %v768_v10  ;;  %947 = vmatpush.msrb.mxu2 %v800_v3  ;;  %v797_v10 = vld [vmem:[#allocation8 + $0x348] sm:$0xff] }
  0xc4   :  { %927 = vmatpush.msrb.mxu1 %v784_v16  ;;  %967 = vmatpush.msrb.mxu3 %v816_v7  ;;  %v812_v16 = vld [vmem:[#allocation8 + $0x3c0] sm:$0xff] }
  0xc5   :  { %908 = vmatpush.msrb.mxu0 %v767_v12  ;;  %948 = vmatpush.msrb.mxu2 %v799_v6  ;;  %v796_v12 = vld [vmem:[#allocation8 + $0x340] sm:$0xff] }
  0xc6   :  { %928 = vmatpush.msrb.mxu1 %v783_v49  ;;  %968 = vmatpush.msrb.mxu3 %v815_v9  ;;  %v792_v49 = vld [vmem:[#allocation8 + $0x320] sm:$0xff] }
  0xc7   :  { %909 = vmatpush.msrb.mxu0 %v766_v14  ;;  %949 = vmatpush.msrb.mxu2 %v798_v8  ;;  %v795_v14 = vld [vmem:[#allocation8 + $0x338] sm:$0xff] }
  0xc8   :  { %929 = vmatpush.msrb.mxu1 %v782_v23  ;;  %969 = vmatpush.msrb.mxu3 %v814_v11  ;;  %v791_v23 = vld [vmem:[#allocation8 + $0x318] sm:$0xff] }
  0xc9   :  { %910 = vmatpush.msrb.mxu0 %v765_v18  ;;  %950 = vmatpush.msrb.mxu2 %v797_v10  ;;  %v811_v18 = vld [vmem:[#allocation8 + $0x3b8] sm:$0xff] }
  0xca   :  { %930 = vmatpush.msrb.mxu1 %v781_v29  ;;  %970 = vmatpush.msrb.mxu3 %v813_v13  ;;  %v665_v29 = vperm.slane %v1213_v15, 5 }
  0xcb   :  { %911 = vmatpush.msrb.mxu0 %v764_v21  ;;  %951 = vmatpush.msrb.mxu2 %v796_v12 }
  0xcc   :  { %931 = vmatpush.msrb.mxu1 %v780_v33  ;;  %971 = vmatpush.msrb.mxu3 %v812_v16 }
  0xcd   :  { %v355_v19 = vpop.f32.mrf.mxu0  ;;  %v375_v48 = vpop.f32.mrf.mxu1  ;;  %912 = vmatpush.msrb.mxu0 %v763_v27  ;;  %952 = vmatpush.msrb.mxu2 %v795_v14  ;;  %v809_v27 = vld [vmem:[#allocation8 + $0x3a8] sm:$0xff] }
  0xce   :  { %v376_v20 = vadd.f32 %v375_v48, %v355_v19  ;;  %932 = vmatpush.msrb.mxu1 %v779_v36  ;;  %v793_v19 = vld [vmem:[#allocation8 + $0x328] sm:$0xff]  ;;  %v664_v48 = vperm.slane %v1213_v15, 4  ;;  %972 = vmatpush.msrb.mxu3 %v811_v18  ;;  %v807_v36 = vld [vmem:[#allocation8 + $0x398] sm:$0xff] }
  0xcf   :  { %913 = vmatpush.msrb.mxu0 %v762_v31  ;;  %v808_v31 = vld [vmem:[#allocation8 + $0x3a0] sm:$0xff] }
  0xd0   :  { %v676_v24 = vsub.f32 %v376_v20, %v660_v17  ;;  %v395_v25 = vpop.f32.mrf.mxu2  ;;  %v415_v26 = vpop.f32.mrf.mxu3  ;;  %933 = vmatpush.msrb.mxu1 %v778_v44  ;;  %v794_v17 = vld [vmem:[#allocation8 + $0x330] sm:$0xff] }
  0xd1   :  { %v416_v28 = vadd.f32 %v415_v26, %v395_v25  ;;  %914 = vmatpush.msrb.mxu0 %v761_v34  ;;  %953 = vmatpush.msrb.mxu2 %v794_v17  ;;  %v790_v26 = vld [vmem:[#allocation8 + $0x310] sm:$0xff] }
  0xd2   :  { %v684_v30 = vmul.f32 %v676_v24, %v676_v24  ;;  %934 = vmatpush.msrb.mxu1 %v777_v52  ;;  %v810_v24 = vld [vmem:[#allocation8 + $0x3b0] sm:$0xff] }
  0xd3   :  { %v677_v32 = vsub.f32 %v416_v28, %v661_v22  ;;  %915 = vmatpush.msrb.mxu0 %v760_v38  ;;  %954 = vmatpush.msrb.mxu2 %v793_v19  ;;  %v806_v38 = vld [vmem:[#allocation8 + $0x390] sm:$0xff] }
  0xd4   :  { %840 = vmatmul.f32.vlgmr.msra.gmra.mxu0 %v684_v30  ;;  %935 = vmatpush.msrb.mxu1 %v776_v55  ;;  %v789_v30 = vld [vmem:[#allocation8 + $0x308] sm:$0xff] }
  0xd5   :  { %v685_v35 = vmul.f32 %v677_v32, %v677_v32  ;;  %916 = vmatpush.msrb.mxu0 %v759_v43  ;;  %955 = vmatpush.msrb.mxu2 %v792_v49 }
  0xd6   :  { %936 = vmatpush.msrb.mxu1 %v775_v59  ;;  %973 = vmatpush.msrb.mxu3 %v810_v24 }
  0xd7   :  { %v435_v39 = vpop.f32.mrf.mxu0  ;;  %v455_v40 = vpop.f32.mrf.mxu1  ;;  %860 = vmatmul.f32.vlgmr.msra.gmra.mxu1 %v685_v35  ;;  %917 = vmatpush.msrb.mxu0 %v758_v51  ;;  %v788_v35 = vld [vmem:[#allocation8 + $0x300] sm:$0xff] }
  0xd8   :  { %v456_v41 = vadd.f32 %v455_v40, %v435_v39  ;;  %937 = vmatpush.msrb.mxu1 %v774_v61  ;;  %956 = vmatpush.msrb.mxu2 %v791_v23  ;;  %v805_v40 = vld [vmem:[#allocation8 + $0x388] sm:$0xff] }
  0xd9   :  { %918 = vmatpush.msrb.mxu0 %v757_v54  ;;  %974 = vmatpush.msrb.mxu3 %v809_v27 }
  0xda   :  { %v678_v45 = vsub.f32 %v456_v41, %v662_v37  ;;  %v475_v46 = vpop.f32.mrf.mxu2  ;;  %v495_v47 = vpop.f32.mrf.mxu3  ;;  %938 = vmatpush.msrb.mxu1 %v773_v63  ;;  %957 = vmatpush.msrb.mxu2 %v790_v26  ;;  %v804_v41 = vld [vmem:[#allocation8 + $0x380] sm:$0xff] }
  0xdb   :  { %v496_v50 = vadd.f32 %v495_v47, %v475_v46  ;;  %919 = vmatpush.msrb.mxu0 %v756_v58  ;;  %975 = vmatpush.msrb.mxu3 %v808_v31 }
  0xdc   :  { %v686_v53 = vmul.f32 %v678_v45, %v678_v45  ;;  %939 = vmatpush.msrb.mxu1 %v772_v1  ;;  %958 = vmatpush.msrb.mxu2 %v789_v30 }
  0xdd   :  { %v679_v56 = vsub.f32 %v496_v50, %v663_v42  ;;  %976 = vmatpush.msrb.mxu3 %v807_v36  ;;  %v666_v42 = vperm.slane %v1213_v15, 6  ;;  %v667_v50 = vperm.slane %v1213_v15, 7 }
  0xde   :  { %880 = vmatmul.f32.vlgmr.msra.gmra.mxu2 %v686_v53 }
  0xdf   :  { %v687_v57 = vmul.f32 %v679_v56, %v679_v56  ;;  %959 = vmatpush.msrb.mxu2 %v788_v35  ;;  %977 = vmatpush.msrb.mxu3 %v806_v38  ;;  %v1013_v56 = vld [vmem:[%s1233_s4] ss:$0 sm:$0xff] }
  0xe1   :  { %900 = vmatmul.f32.vlgmr.msra.gmra.mxu3 %v687_v57 }
  0xe2   :  { %978 = vmatpush.msrb.mxu3 %v805_v40 }
  0xe4   :  { %979 = vmatpush.msrb.mxu3 %v804_v41 }
  0xf6   :  { %v515_v20 = vpop.f32.mrf.mxu0  ;;  %v535_v21 = vpop.f32.mrf.mxu1 }
  0xf7   :  { %v536_v22 = vadd.f32 %v535_v21, %v515_v20 }
  0xf9   :  { %v680_v25 = vsub.f32 %v536_v22, %v664_v48 }
  0xfb   :  { %v688_v28 = vmul.f32 %v680_v25, %v680_v25 }
  0xfd   :  { %v555_v32 = vpop.f32.mrf.mxu2  ;;  %v575_v33 = vpop.f32.mrf.mxu3  ;;  %920 = vmatmul.f32.vlgmr.msrb.gmra.mxu0 %v688_v28 }
  0xfe   :  { %v576_v34 = vadd.f32 %v575_v33, %v555_v32 }
 0x100   :  { %v681_v37 = vsub.f32 %v576_v34, %v665_v29 }
 0x102   :  { %v689_v39 = vmul.f32 %v681_v37, %v681_v37 }
 0x104   :  { %940 = vmatmul.f32.vlgmr.msrb.gmra.mxu1 %v689_v39 }
 0x118   :  { %v595_v43 = vpop.f32.mrf.mxu0  ;;  %v615_v44 = vpop.f32.mrf.mxu1 }
 0x119   :  { %v616_v45 = vadd.f32 %v615_v44, %v595_v43 }
 0x11b   :  { %v682_v46 = vsub.f32 %v616_v45, %v666_v42 }
 0x11d   :  { %v690_v47 = vmul.f32 %v682_v46, %v682_v46 }
 0x11f   :  { %v635_v51 = vpop.f32.mrf.mxu2  ;;  %v655_v52 = vpop.f32.mrf.mxu3  ;;  %960 = vmatmul.f32.vlgmr.msrb.gmra.mxu2 %v690_v47 }
 0x120   :  { %v656_v53 = vadd.f32 %v655_v52, %v635_v51 }
 0x122   :  { %v683_v54 = vsub.f32 %v656_v53, %v667_v50 }
 0x124   :  { %v691_v55 = vmul.f32 %v683_v54, %v683_v54 }
 0x126   :  { %980 = vmatmul.f32.vlgmr.msrb.gmra.mxu3 %v691_v55 }
 0x151   :  { %v841_v57 = vpop.f32.mrf.mxu0 }
 0x152   :  { %v842_v58 = vadd.f32 %v1013_v56, %v841_v57 }
 0x154   :  { %v861_v59 = vpop.f32.mrf.mxu1 }
 0x155   :  { %v862_v60 = vadd.f32 %v861_v59, %v842_v58 }
 0x161   :  { %v881_v61 = vpop.f32.mrf.mxu2 }
 0x162   :  { %v882_v63 = vadd.f32 %v881_v61, %v862_v60 }
 0x164   :  { %v901_v62 = vpop.f32.mrf.mxu3 }
 0x165   :  { %v902_v15 = vadd.f32 %v901_v62, %v882_v63 }
 0x17a   :  { %v921_v0 = vpop.f32.mrf.mxu0 }
 0x17b   :  { %v922_v2 = vadd.f32 %v921_v0, %v902_v15 }
 0x181   :  { %v941_v1 = vpop.f32.mrf.mxu1 }
 0x182   :  { %v942_v4 = vadd.f32 %v941_v1, %v922_v2 }
 0x1a2   :  { %v961_v3 = vpop.f32.mrf.mxu2 }
 0x1a3   :  { %v962_v5 = vadd.f32 %v961_v3, %v942_v4 }
 0x1a9   :  { %v981_v6 = vpop.f32.mrf.mxu3 }
 0x1aa   :  { %v982_v7 = vadd.f32 %v981_v6, %v962_v5 }
 0x1ac   :  { %984 = vst [vmem:[#allocation10] sm:$0xff] %v982_v7 }
 0x1ad   :  { %995 = dma.vmem_to_hbm [thread:$0]  %s991_s16, 128, %s993_s19, [#allocation4]  }
 0x1ae   :  { %1140 = dma.done.wait [#allocation4], 128  }
 0x1af   :  { %1141 = vsyncadd [#allocation4], 4294967168 }
 0x1b0   :  { %1000 = vsyncpa [#allocation3], 1 }
 0x1b1   :  { %1001 = vsyncpa [#allocation6], 1 }
 0x1b2   :  { %1002 = vsyncpa [#allocation9], 1 }
 0x1b3   :  { %1003 = vsyncpa [#allocation4], 1 }

</bundles_post_ra>
